<compile_context>
chip_gen: v5e
topology: v5e:2x2
jax: 0.10.0
libtpu: 0.0.40
codegen_flags: <defaults>
</compile_context>

<pallas_src>
import math

import jax
import jax.numpy as jnp
from jax import lax
from jax.experimental import pallas as pl
from jax.experimental.pallas import tpu as pltpu


def _unpack_kernel(packed_ref, out_ref):
    # packed_ref: (TILE_B, N_WORDS32) uint32  -- packed spin bits
    # out_ref   : (TILE_B, W_PAD)     float32 -- unpacked +/-1 spins (lane dense)
    words = packed_ref[...]                      # (TB, NW) uint32
    tb, wp = out_ref.shape
    nw = words.shape[1]

    # Row-invariant per-column bit coordinates, computed at (1, W).
    col = lax.broadcasted_iota(jnp.int32, (1, wp), 1)        # spin index j
    word_idx = col >> 5                                      # j // 32 (int32)
    bit_idx = (col & 31).astype(jnp.uint32)                  # j % 32  (uint32)

    # Select the packed word for each output column without a lane-gather:
    # small static loop over the (few) 32-bit words, pure VPU selects.
    sel = jnp.zeros((tb, wp), dtype=jnp.uint32)
    for w in range(nw):
        sel = jnp.where(word_idx == w, words[:, w:w + 1], sel)

    # Bit trick: put bit j in the sign position, XOR with -1.0's pattern.
    #   bit=1 -> 0x80000000 ^ 0xBF800000 = 0x3F800000 = +1.0
    #   bit=0 -> 0x00000000 ^ 0xBF800000 = 0xBF800000 = -1.0
    sign = (sel >> bit_idx) << jnp.uint32(31)
    out_ref[...] = pltpu.bitcast(sign ^ jnp.uint32(0xBF800000), jnp.float32)


def _round_up(x: int, m: int) -> int:
    return ((x + m - 1) // m) * m


def unpack(packed_u32: jax.Array, number_spins: int, *,
           tile_b: int | None = None,
           vmem_target_bytes: int = 2 << 20) -> jax.Array:
    """Pallas equivalent of Unpack(number_spins).forward.

    packed_u32: (batch, n_words32) uint32, little-endian 32-bit words.
    returns   : (batch, number_spins) float32 with +/-1 entries.
    """
    batch, n_words = packed_u32.shape
    if n_words * 32 < number_spins:
        raise ValueError("not enough packed 32-bit words for number_spins")

    # Fold several batch rows into one lane-dense output row whenever the bit
    # layout permits it (number_spins a multiple of 32 occupying exactly
    # n_words words).  In folded coordinates bit j still lives in word j>>5.
    if number_spins % 32 == 0 and n_words * 32 == number_spins:
        fold = 128 // math.gcd(number_spins, 128)
    else:
        fold = 1

    w_out = fold * number_spins                 # folded output width
    w_pad = _round_up(w_out, 128)               # lane-dense kernel width
    nwf = fold * n_words                        # words per folded row

    # ---- fold / pad the batch axis ----
    x = packed_u32
    batch_p1 = _round_up(batch, fold)
    if batch_p1 != batch:
        x = jnp.pad(x, ((0, batch_p1 - batch), (0, 0)))
    batch_f = batch_p1 // fold
    if fold > 1:
        x = x.reshape(batch_f, nwf)

    # ---- pick the batch tile (multiple of 8, ~vmem_target_bytes of output) ----
    if tile_b is None:
        tile_b = max(8, (vmem_target_bytes // (w_pad * 4)) // 8 * 8)
    if tile_b % 8 != 0:
        raise ValueError("tile_b must be a multiple of 8")
    tile_b = min(tile_b, _round_up(batch_f, 8))

    batch_fp = _round_up(batch_f, tile_b)
    if batch_fp != batch_f:
        x = jnp.pad(x, ((0, batch_fp - batch_f), (0, 0)))

    grid = (batch_fp // tile_b,)
    bytes_accessed = batch_fp * (nwf * 4 + w_pad * 4)

    out = pl.pallas_call(
        _unpack_kernel,
        out_shape=jax.ShapeDtypeStruct((batch_fp, w_pad), jnp.float32),
        grid_spec=pltpu.PrefetchScalarGridSpec(
            num_scalar_prefetch=0,
            grid=grid,
            in_specs=[pl.BlockSpec((tile_b, nwf), lambda i: (i, 0))],
            out_specs=pl.BlockSpec((tile_b, w_pad), lambda i: (i, 0)),
        ),
        compiler_params=pltpu.CompilerParams(
            dimension_semantics=("parallel",),
            vmem_limit_bytes=32 * 1024 * 1024,
        ),
        cost_estimate=pl.CostEstimate(
            flops=0, transcendentals=0, bytes_accessed=bytes_accessed),
    )(x)

    # ---- undo padding / folding ----
    out = out[:batch_f, :w_out]
    if fold > 1:
        out = out.reshape(batch_f * fold, number_spins)
    return out[:batch, :number_spins]


def unpack_reference(packed_u32: jax.Array, number_spins: int) -> jax.Array:
    """Plain-JAX reference for correctness checking."""
    col = jnp.arange(number_spins, dtype=jnp.uint32)[None, :]          # (1, ns)
    word = jnp.take(packed_u32, (col[0] >> 5).astype(jnp.int32), axis=1)  # (b, ns)
    bits = (word >> (col & jnp.uint32(31))) & jnp.uint32(1)            # broadcasts
    return bits.astype(jnp.float32) * 2.0 - 1.0


if __name__ == "__main__":
    key = jax.random.PRNGKey(0)

    # (number_spins, batch, n_words32): uint64 case, odd-batch fold case,
    # non-multiple-of-32 case, ls_bits512 case.
    cases = [
        (64, 16, 2),     # one uint64 per configuration, fold=2 -> 128 lanes
        (64, 13, 2),     # odd batch exercises padding
        (50, 12, 2),     # number_spins not a multiple of 32 (lane-pad path)
        (512, 8, 16),    # ls_bits512, already lane dense
    ]

    for number_spins, batch, n_words32 in cases:
        key, sub = jax.random.split(key)
        packed = jax.random.bits(sub, (batch, n_words32), dtype=jnp.uint32)

        out = unpack(packed, number_spins)
        out = jax.block_until_ready(out)
        ref = unpack_reference(packed, number_spins)

        assert out.shape == (batch, number_spins), (out.shape, batch, number_spins)
        assert out.dtype == jnp.float32
        assert bool(jnp.all(out == ref)), (
            f"Pallas unpack mismatch vs reference (ns={number_spins}, b={batch})")
        # Every entry must be exactly +/-1, matching unpack_bits.unpack semantics.
        assert bool(jnp.all(jnp.abs(out) == 1.0))

    print("KERNEL_OK")
</pallas_src>

<mosaic_0001>
module attributes {stable_mosaic.version = 11 : i64} {
  func.func @_unpack_kernel(%arg0: i32, %arg1: memref<8x4xi32, #tpu.memory_space<vmem>>, %arg2: memref<8x128xf32, #tpu.memory_space<vmem>>) attributes {dimension_semantics = [#tpu.dimension_semantics<parallel>], iteration_bounds = array<i64: 1>, scalar_prefetch = 0 : i64, scratch_operands = 0 : i64, tpu.core_type = #tpu.core_type<tc>, window_params = [{transform_indices = @transform_0, window_bounds = array<i64: 8, 4>}, {transform_indices = @transform_1, window_bounds = array<i64: 8, 128>}]} {
    %c0 = arith.constant 0 : index
    %c0_0 = arith.constant 0 : index
    %0 = vector.load %arg1[%c0, %c0_0] : memref<8x4xi32, #tpu.memory_space<vmem>>, vector<8x4xi32>
    %1 = tpu.iota {dimensions = array<i32: 1>} : vector<1x128xi32>
    %c5_i32 = arith.constant 5 : i32
    %2 = vector.broadcast %c5_i32 : i32 to vector<1x128xi32>
    %3 = arith.shrsi %1, %2 : vector<1x128xi32>
    %c31_i32 = arith.constant 31 : i32
    %4 = vector.broadcast %c31_i32 : i32 to vector<1x128xi32>
    %5 = arith.andi %1, %4 : vector<1x128xi32>
    %c0_i32 = arith.constant 0 : i32
    %6 = vector.broadcast %c0_i32 : i32 to vector<8x128xi32>
    %c0_i32_1 = arith.constant 0 : i32
    %7 = vector.broadcast %c0_i32_1 : i32 to vector<1x128xi32>
    %8 = arith.cmpi eq, %3, %7 : vector<1x128xi32>
    %9 = vector.extract_strided_slice %0 {offsets = [0, 0], sizes = [8, 1], strides = [1, 1]} : vector<8x4xi32> to vector<8x1xi32>
    %10 = vector.shape_cast %8 : vector<1x128xi1> to vector<1x128xi1>
    %11 = vector.broadcast %10 : vector<1x128xi1> to vector<8x128xi1>
    %12 = vector.shape_cast %9 : vector<8x1xi32> to vector<8x1xi32>
    %13 = vector.broadcast %12 : vector<8x1xi32> to vector<8x128xi32>
    %14 = arith.select %11, %13, %6 : vector<8x128xi1>, vector<8x128xi32>
    %c1_i32 = arith.constant 1 : i32
    %15 = vector.broadcast %c1_i32 : i32 to vector<1x128xi32>
    %16 = arith.cmpi eq, %3, %15 : vector<1x128xi32>
    %17 = vector.extract_strided_slice %0 {offsets = [0, 1], sizes = [8, 1], strides = [1, 1]} : vector<8x4xi32> to vector<8x1xi32>
    %18 = vector.shape_cast %16 : vector<1x128xi1> to vector<1x128xi1>
    %19 = vector.broadcast %18 : vector<1x128xi1> to vector<8x128xi1>
    %20 = vector.shape_cast %17 : vector<8x1xi32> to vector<8x1xi32>
    %21 = vector.broadcast %20 : vector<8x1xi32> to vector<8x128xi32>
    %22 = arith.select %19, %21, %14 : vector<8x128xi1>, vector<8x128xi32>
    %c2_i32 = arith.constant 2 : i32
    %23 = vector.broadcast %c2_i32 : i32 to vector<1x128xi32>
    %24 = arith.cmpi eq, %3, %23 : vector<1x128xi32>
    %25 = vector.extract_strided_slice %0 {offsets = [0, 2], sizes = [8, 1], strides = [1, 1]} : vector<8x4xi32> to vector<8x1xi32>
    %26 = vector.shape_cast %24 : vector<1x128xi1> to vector<1x128xi1>
    %27 = vector.broadcast %26 : vector<1x128xi1> to vector<8x128xi1>
    %28 = vector.shape_cast %25 : vector<8x1xi32> to vector<8x1xi32>
    %29 = vector.broadcast %28 : vector<8x1xi32> to vector<8x128xi32>
    %30 = arith.select %27, %29, %22 : vector<8x128xi1>, vector<8x128xi32>
    %c3_i32 = arith.constant 3 : i32
    %31 = vector.broadcast %c3_i32 : i32 to vector<1x128xi32>
    %32 = arith.cmpi eq, %3, %31 : vector<1x128xi32>
    %33 = vector.extract_strided_slice %0 {offsets = [0, 3], sizes = [8, 1], strides = [1, 1]} : vector<8x4xi32> to vector<8x1xi32>
    %34 = vector.shape_cast %32 : vector<1x128xi1> to vector<1x128xi1>
    %35 = vector.broadcast %34 : vector<1x128xi1> to vector<8x128xi1>
    %36 = vector.shape_cast %33 : vector<8x1xi32> to vector<8x1xi32>
    %37 = vector.broadcast %36 : vector<8x1xi32> to vector<8x128xi32>
    %38 = arith.select %35, %37, %30 : vector<8x128xi1>, vector<8x128xi32>
    %39 = vector.broadcast %5 : vector<1x128xi32> to vector<8x128xi32>
    %40 = arith.shrui %38, %39 : vector<8x128xi32>
    %c31_i32_2 = arith.constant 31 : i32
    %41 = vector.broadcast %c31_i32_2 : i32 to vector<8x128xi32>
    %42 = arith.shli %40, %41 : vector<8x128xi32>
    %c-1082130432_i32 = arith.constant -1082130432 : i32
    %43 = vector.broadcast %c-1082130432_i32 : i32 to vector<8x128xi32>
    %44 = arith.xori %42, %43 : vector<8x128xi32>
    %45 = tpu.bitcast %44 : vector<8x128xi32> -> vector<8x128xf32>
    %c0_3 = arith.constant 0 : index
    %c0_4 = arith.constant 0 : index
    %46 = vector.load %arg2[%c0_3, %c0_4] : memref<8x128xf32, #tpu.memory_space<vmem>>, vector<8x128xf32>
    tpu.vector_store %arg2[%c0_3, %c0_4], %45 {strides = array<i32>} : memref<8x128xf32, #tpu.memory_space<vmem>>, vector<8x128xf32>,
    return
  }
  func.func @transform_0(%arg0: i32) -> (i32, i32) {
    %c0_i32 = arith.constant 0 : i32
    %c0_i32_0 = arith.constant 0 : i32
    return %arg0, %c0_i32 : i32, i32
  }
  func.func @transform_1(%arg0: i32) -> (i32, i32) {
    %c0_i32 = arith.constant 0 : i32
    %c0_i32_0 = arith.constant 0 : i32
    return %arg0, %c0_i32 : i32, i32
  }
}

</mosaic_0001>

<bundles_post_ra>
// kernel: tpu_custom_call.1
= control target key start
LH: loop header
LB: loop body
LE: loop exit
PB: predicated region body
PF: predicated region fallthrough
CT: control target
= control target key end

     0   :  { %v99_v1 = vmov 0   ;;  %v100_v2 = vmov 2   ;;  %s120_s0 = inlined_call_operand.vmem [shape: u32[8,4], index: 0, kind: input, shape index: {}]   ;;  %s121_s1 = inlined_call_operand.hbm [shape: f32[8,128], index: 1, kind: output, shape index: {}]  }
   0x1   :  { %v9_v0 = vld [vmem:[%s120_s0] sm:$0xff]  ;;  %68 = vset.pattern.permute.xlu0 %v99_v1  ;;  %70 = vset.pattern.permute.xlu1 %v100_v2 }
   0x2   :  { %6 = vsyncpa [#allocation3], 0  ;;  %18 = vperm.xlu0 %68, %v9_v0   ;;  %32 = vperm.xlu1 %70, %v9_v0   ;;  %v101_v3 = vmov 1   ;;  %v102_v4 = vmov 3   ;;  %v10_v5 = vlaneseq  ;;  %s103_s0 = smov [#allocation2]   ;;  %s54_s11 = sshll.u32 %s121_s1, 4  ;;  %s55_s11 = int_to_ptr.hbm [resolvable:$true] %s54_s11 }
   0x3   :  { %s52_s8 = sshll.u32 %s103_s0, 4  ;;  %s53_s8 = int_to_ptr.vmem [resolvable:$true] %s52_s8 }
   0x4   :  { %v11_v6 = vand.u32 127, %v10_v5 }
   0x6   :  { %v12_v9 = vshra.s32 %v11_v6, 5  ;;  %v13_v12 = vand.u32 31, %v11_v6 }
   0x8   :  { %vm14_vm0 = vcmp.eq.s32.totalorder %v12_v9, 0  ;;  %vm21_vm1 = vcmp.eq.s32.totalorder %v12_v9, 1  ;;  %vm28_vm2 = vcmp.eq.s32.totalorder %v12_v9, 2  ;;  %vm35_vm3 = vcmp.eq.s32.totalorder %v12_v9, 3 }
   0xa   :  { %69 = vset.pattern.permute.xlu0 %v101_v3  ;;  %71 = vset.pattern.permute.xlu1 %v102_v4 }
   0xb   :  { %25 = vperm.xlu0 %69, %v9_v0   ;;  %39 = vperm.xlu1 %71, %v9_v0  }
  0x13   :  { %72 = vset.pattern.permute.xlu0 %v102_v4 }
  0x74   :  { %v19_v7 = vpop.permute.xlu0 %18  ;;  %v33_v8 = vpop.permute.xlu1 %32 }
  0x75   :  { %v20_v10 = vsel %vm14_vm0, %v19_v7, 0 }
  0x7d   :  { %v26_v11 = vpop.permute.xlu0 %25  ;;  %v40_v13 = vpop.permute.xlu1 %39 }
  0x7e   :  { %v27_v14 = vsel %vm21_vm1, %v26_v11, %v20_v10 }
  0x7f   :  { %v34_v15 = vsel %vm28_vm2, %v33_v8, %v27_v14 }
  0x80   :  { %v41_v16 = vsel %vm35_vm3, %v40_v13, %v34_v15 }
  0x81   :  { %v42_v17 = vshrl.u32 %v41_v16, %v13_v12 }
  0x83   :  { %v43_v18 = vshll.u32 %v42_v17, 31 }
  0x85   :  { %v44_v19 = vxor.u32 3212836864, %v43_v18 }
  0x87   :  { %46 = vst [vmem:[#allocation2] sm:$0xff] %v44_v19 }
  0x88   :  { %57 = dma.vmem_to_hbm [thread:$0]  %s53_s8, 128, %s55_s11, [#allocation3]  }
  0x89   :  { %97 = dma.done.wait [#allocation3], 128  }
  0x8a   :  { %98 = vsyncadd [#allocation3], 4294967168 }
  0x8b   :  { %62 = vsyncpa [#allocation3], 1 }

</bundles_post_ra>
